<compile_context>
chip_gen: v7x
topology: tpu7x:2x2x1
jax: 0.10.0
libtpu: 0.0.40
codegen_flags: <defaults>
</compile_context>

<pallas_src>
import functools

import jax
import jax.numpy as jnp
from jax import lax
from jax.experimental import pallas as pl
from jax.experimental.pallas import tpu as pltpu

NEG_SLOPE = 0.2     # GATConv negative_slope
NEG_INF = -1e30     # mask sentinel (f32 score math)


# ----------------------------- fused Pallas kernel --------------------------- #
def _gat_layer(h, mask, w_aug, alw, bias_mean, *, num_heads, out_per_head):
    """One GATConv layer + mean over heads + ELU, on VMEM-resident values.

    h         : [N, Fin]        f32 node features
    mask      : [N, N]          bool, mask[v, u] = True iff edge u -> v   ([dst, src])
    w_aug     : [Fin, H*D + H]  bf16, columns = [W | (W_h @ attn_r_h) per head]
    alw       : [H, Fin]        bf16, attn_l folded through W (alw[h] = W_h @ attn_l_h)
    bias_mean : [1, D]          f32, GATConv bias averaged over heads
    returns   : [N, D]          f32
    """
    n = h.shape[0]
    hd = num_heads * out_per_head
    h_b = h.astype(jnp.bfloat16)

    # Widened projection: feat (all heads) and er (dst-side logits) in one MXU matmul.
    feat_aug = jnp.dot(h_b, w_aug, preferred_element_type=jnp.float32)     # [N, H*D + H]

    # Lane-oriented src-side logits for ALL heads in one MXU pass:
    #   el_rows[h, u] = <W_h @ attn_l_h, x_u>
    el_rows = lax.dot_general(alw, h_b, (((1,), (1,)), ((), ())),
                              preferred_element_type=jnp.float32)          # [H, N]

    acc = jnp.zeros((n, out_per_head), jnp.float32)
    inv_heads = 1.0 / num_heads
    for hh in range(num_heads):                                            # static unroll (H = 2)
        lo = hh * out_per_head
        feat_h = feat_aug[:, lo:lo + out_per_head]                         # [N, D] src feats
        er_col = feat_aug[:, hd + hh:hd + hh + 1]                          # [N, 1] dst logits
        el_row = el_rows[hh:hh + 1, :]                                     # [1, N] src logits

        # e[v, u] = LeakyReLU(er[v] + el[u])
        e = er_col + el_row                                                # [N, N]
        e = jnp.where(e > 0, e, NEG_SLOPE * e)

        # masked softmax over incoming edges (src axis = lanes), UNNORMALIZED
        masked = jnp.where(mask, e, NEG_INF)
        m = jnp.max(masked, axis=1, keepdims=True)                         # [N, 1]
        m = jnp.where(m <= NEG_INF, 0.0, m)                                # zero in-degree guard
        p = jnp.where(mask, jnp.exp(jnp.minimum(e - m, 0.0)), 0.0)         # [N, N], inf-safe
        denom = jnp.sum(p, axis=1, keepdims=True)                          # [N, 1]

        # Aggregate first (natural lhs-last x rhs-first MXU orientation), normalize after;
        # the 1/num_heads mean is folded into the same reciprocal scale.
        rst_h = jnp.dot(p.astype(jnp.bfloat16), feat_h.astype(jnp.bfloat16),
                        preferred_element_type=jnp.float32)                # [N, D]
        inv = pl.reciprocal(jnp.where(denom == 0.0, 1.0, denom), approx=True) * inv_heads
        acc = acc + rst_h * inv

    mean_h = acc + bias_mean
    # ELU
    return jnp.where(mean_h > 0, mean_h, jnp.exp(jnp.minimum(mean_h, 0.0)) - 1.0)


def _gat_encoder_kernel(x_ref, adjT_ref, w1_ref, al1_ref, b1_ref,
                        w2_ref, al2_ref, b2_ref, out_ref,
                        *, num_heads, d1, d2):
    # adjacency mask hoisted once, shared by both layers and both heads
    mask = adjT_ref[...].astype(jnp.float32) > 0.0                         # [N, N] (dst, src)

    h = _gat_layer(x_ref[...], mask, w1_ref[...], al1_ref[...], b1_ref[...],
                   num_heads=num_heads, out_per_head=d1)
    h = _gat_layer(h, mask, w2_ref[...], al2_ref[...], b2_ref[...],
                   num_heads=num_heads, out_per_head=d2)
    out_ref[...] = h.astype(out_ref.dtype)


# ------------------------------ host-side wrapper ----------------------------- #
def _prep_layer_params(p, num_heads, out_dim):
    """Host-side parameter folding (done once; would be cached in real use)."""
    w, al, ar, b = p["w"], p["attn_l"], p["attn_r"], p["bias"]
    fin = w.shape[0]
    w_heads = w.reshape(fin, num_heads, out_dim)
    w_er = jnp.einsum("fhd,hd->fh", w_heads, ar)                  # fold attn_r: [Fin, H]
    w_aug = jnp.concatenate([w, w_er], axis=1).astype(jnp.bfloat16)
    alw = jnp.einsum("fhd,hd->hf", w_heads, al).astype(jnp.bfloat16)   # fold attn_l: [H, Fin]
    b_mean = b.reshape(num_heads, out_dim).mean(axis=0, keepdims=True)
    return w_aug, alw, b_mean.astype(jnp.float32)


def gat_encoder_forward(adj, features, layer_params, layer_out_dims, num_heads=2):
    """Fused 2-layer GATEncoder forward (eval mode).

    adj[u, v] = 1 iff edge u -> v (src rows, dst cols); passed transposed + int8 to the kernel.
    """
    assert len(layer_params) == 2 and len(layer_out_dims) == 2
    d1, d2 = layer_out_dims
    n = features.shape[0]

    adj_t = adj.T.astype(jnp.int8)                                # [dst, src], 4x smaller
    w1, al1, b1 = _prep_layer_params(layer_params[0], num_heads, d1)
    w2, al2, b2 = _prep_layer_params(layer_params[1], num_heads, d2)

    kernel = functools.partial(_gat_encoder_kernel, num_heads=num_heads, d1=d1, d2=d2)
    vmem = pl.BlockSpec(memory_space=pltpu.MemorySpace.VMEM)
    # TODO(synk): for large graphs, tile over destination nodes (128-multiple row blocks of
    # adj_t, lane-dense output tiles, "parallel" dst axis for v7x megacore) instead of the
    # grid-less whole-array VMEM design used here for launch-overhead-bound small N.
    return pl.pallas_call(
        kernel,
        out_shape=jax.ShapeDtypeStruct((n, d2), jnp.float32),
        in_specs=[vmem] * 8,
        out_specs=vmem,
    )(features.astype(jnp.float32), adj_t, w1, al1, b1, w2, al2, b2)


# ------------------------------ parameter init -------------------------------- #
def init_gat_params(key, in_dim, out_dim, num_heads):
    k1, k2, k3, k4 = jax.random.split(key, 4)
    return dict(
        w=jax.random.normal(k1, (in_dim, num_heads * out_dim), jnp.float32) * 0.1,
        attn_l=jax.random.normal(k2, (num_heads, out_dim), jnp.float32) * 0.1,
        attn_r=jax.random.normal(k3, (num_heads, out_dim), jnp.float32) * 0.1,
        bias=jax.random.normal(k4, (1, num_heads * out_dim), jnp.float32) * 0.01,
    )


# --------------------------- pure-JAX f32 reference ---------------------------- #
def _gat_layer_ref(x, adj, p, num_heads, out_per_head):
    feat = (x @ p["w"]).reshape(x.shape[0], num_heads, out_per_head)       # [N,H,D]
    el = jnp.einsum("nhd,hd->nh", feat, p["attn_l"])                       # [N,H]
    er = jnp.einsum("nhd,hd->nh", feat, p["attn_r"])                       # [N,H]
    e = el[:, None, :] + er[None, :, :]                                    # [u,v,H]
    e = jnp.where(e > 0, e, NEG_SLOPE * e)
    mask = adj[:, :, None] > 0
    masked = jnp.where(mask, e, -jnp.inf)
    m = jnp.max(masked, axis=0, keepdims=True)
    m = jnp.where(jnp.isfinite(m), m, 0.0)
    pexp = jnp.where(mask, jnp.exp(e - m), 0.0)
    denom = jnp.sum(pexp, axis=0, keepdims=True)
    alpha = pexp / jnp.where(denom == 0.0, 1.0, denom)                     # [u,v,H]
    rst = jnp.einsum("uvh,uhd->vhd", alpha, feat)                          # [N,H,D]
    rst = rst + p["bias"].reshape(1, num_heads, out_per_head)
    h = rst.mean(axis=1)
    return jnp.where(h > 0, h, jnp.exp(jnp.minimum(h, 0.0)) - 1.0)


# ----------------------------------- main -------------------------------------- #
if __name__ == "__main__":
    N, IN_DIM, HIDDEN, OUT_DIM, H = 8, 16, 32, 32, 2

    root = jax.random.PRNGKey(0)
    k_feat, k_adj, k_p0, k_p1 = jax.random.split(root, 4)

    features = jax.random.normal(k_feat, (N, IN_DIM), jnp.float32)
    # random directed graph with self-loops (keeps every in-degree >= 1)
    adj = jax.random.bernoulli(k_adj, 0.4, (N, N)).astype(jnp.float32)
    adj = jnp.maximum(adj, jnp.eye(N, dtype=jnp.float32))

    # GATEncoder(in_dim, hidden_dim, out_dim, num_layers=2): input_conv + 1 appended conv
    params = [
        init_gat_params(k_p0, IN_DIM, HIDDEN, H),    # input_conv: in_dim -> hidden
        init_gat_params(k_p1, HIDDEN, OUT_DIM, H),   # convs[-1]:  hidden -> out_dim
    ]
    out_dims = [HIDDEN, OUT_DIM]

    out = gat_encoder_forward(adj, features, params, out_dims, num_heads=H)
    out = jax.block_until_ready(out)

    # correctness check vs. pure-f32 reference (tolerance covers bf16 MXU operands and
    # the EUP approximate reciprocal used for softmax normalization)
    ref = features
    for p, d in zip(params, out_dims):
        ref = _gat_layer_ref(ref, adj, p, H, d)
    assert out.shape == (N, OUT_DIM)
    assert jnp.allclose(out, ref, rtol=5e-2, atol=5e-2), "mismatch vs reference"

    print("KERNEL_OK")
</pallas_src>

<mosaic_0001>
module attributes {stable_mosaic.version = 11 : i64} {
  func.func @_gat_encoder_kernel(%arg0: memref<8x16xf32, #tpu.memory_space<vmem>>, %arg1: memref<8x8xi8, #tpu.memory_space<vmem>>, %arg2: memref<16x66xbf16, #tpu.memory_space<vmem>>, %arg3: memref<2x16xbf16, #tpu.memory_space<vmem>>, %arg4: memref<1x32xf32, #tpu.memory_space<vmem>>, %arg5: memref<32x66xbf16, #tpu.memory_space<vmem>>, %arg6: memref<2x32xbf16, #tpu.memory_space<vmem>>, %arg7: memref<1x32xf32, #tpu.memory_space<vmem>>, %arg8: memref<8x32xf32, #tpu.memory_space<vmem>>) attributes {dimension_semantics = [], scalar_prefetch = 0 : i64, scratch_operands = 0 : i64, tpu.core_type = #tpu.core_type<tc>} {
    %c0 = arith.constant 0 : index
    %c0_0 = arith.constant 0 : index
    %0 = vector.load %arg1[%c0, %c0_0] : memref<8x8xi8, #tpu.memory_space<vmem>>, vector<8x8xi8>
    %1 = arith.sitofp %0 : vector<8x8xi8> to vector<8x8xf32>
    %cst = arith.constant 0.000000e+00 : f32
    %2 = vector.broadcast %cst : f32 to vector<8x8xf32>
    %3 = arith.cmpf ogt, %1, %2 : vector<8x8xf32>
    %c0_1 = arith.constant 0 : index
    %c0_2 = arith.constant 0 : index
    %4 = vector.load %arg0[%c0_1, %c0_2] : memref<8x16xf32, #tpu.memory_space<vmem>>, vector<8x16xf32>
    %c0_3 = arith.constant 0 : index
    %c0_4 = arith.constant 0 : index
    %5 = vector.load %arg2[%c0_3, %c0_4] : memref<16x66xbf16, #tpu.memory_space<vmem>>, vector<16x66xbf16>
    %c0_5 = arith.constant 0 : index
    %c0_6 = arith.constant 0 : index
    %6 = vector.load %arg3[%c0_5, %c0_6] : memref<2x16xbf16, #tpu.memory_space<vmem>>, vector<2x16xbf16>
    %c0_7 = arith.constant 0 : index
    %c0_8 = arith.constant 0 : index
    %7 = vector.load %arg4[%c0_7, %c0_8] : memref<1x32xf32, #tpu.memory_space<vmem>>, vector<1x32xf32>
    %8 = arith.truncf %4 : vector<8x16xf32> to vector<8x16xbf16>
    %cst_9 = arith.constant dense<0.000000e+00> : vector<8x66xf32>
    %9 = tpu.matmul %8, %5, %cst_9 {dimension_numbers = #tpu.dot_dimension_numbers<[1], [0], [0], [1], [0, 0, 1, 1], [], []>} : vector<8x16xbf16>, vector<16x66xbf16>, vector<8x66xf32> -> vector<8x66xf32>
    %cst_10 = arith.constant dense<0.000000e+00> : vector<2x8xf32>
    %10 = tpu.matmul %6, %8, %cst_10 {dimension_numbers = #tpu.dot_dimension_numbers<[1], [1], [0], [0], [0, 0, 1, 0], [], []>} : vector<2x16xbf16>, vector<8x16xbf16>, vector<2x8xf32> -> vector<2x8xf32>
    %cst_11 = arith.constant 0.000000e+00 : f32
    %11 = vector.broadcast %cst_11 : f32 to vector<8x32xf32>
    %12 = vector.extract_strided_slice %9 {offsets = [0, 0], sizes = [8, 32], strides = [1, 1]} : vector<8x66xf32> to vector<8x32xf32>
    %13 = vector.extract_strided_slice %9 {offsets = [0, 64], sizes = [8, 1], strides = [1, 1]} : vector<8x66xf32> to vector<8x1xf32>
    %14 = vector.extract_strided_slice %10 {offsets = [0, 0], sizes = [1, 8], strides = [1, 1]} : vector<2x8xf32> to vector<1x8xf32>
    %15 = vector.broadcast %13 : vector<8x1xf32> to vector<8x8xf32>
    %16 = vector.broadcast %14 : vector<1x8xf32> to vector<8x8xf32>
    %17 = arith.addf %15, %16 : vector<8x8xf32>
    %cst_12 = arith.constant 0.000000e+00 : f32
    %18 = vector.broadcast %cst_12 : f32 to vector<8x8xf32>
    %19 = arith.cmpf ogt, %17, %18 : vector<8x8xf32>
    %cst_13 = arith.constant 2.000000e-01 : f32
    %20 = vector.broadcast %cst_13 : f32 to vector<8x8xf32>
    %21 = arith.mulf %20, %17 : vector<8x8xf32>
    %22 = arith.select %19, %17, %21 : vector<8x8xi1>, vector<8x8xf32>
    %cst_14 = arith.constant -1.000000e+30 : f32
    %23 = vector.broadcast %cst_14 : f32 to vector<8x8xf32>
    %24 = arith.select %3, %22, %23 : vector<8x8xi1>, vector<8x8xf32>
    %cst_15 = arith.constant dense<0xFF800000> : vector<8xf32>
    %25 = vector.multi_reduction <maximumf>, %24, %cst_15 [1] : vector<8x8xf32> to vector<8xf32>
    %26 = vector.shape_cast %25 : vector<8xf32> to vector<8x1xf32>
    %cst_16 = arith.constant -1.000000e+30 : f32
    %27 = vector.broadcast %cst_16 : f32 to vector<8x1xf32>
    %28 = arith.cmpf ole, %26, %27 : vector<8x1xf32>
    %cst_17 = arith.constant 0.000000e+00 : f32
    %29 = vector.broadcast %cst_17 : f32 to vector<8x1xf32>
    %30 = arith.select %28, %29, %26 : vector<8x1xi1>, vector<8x1xf32>
    %31 = vector.broadcast %30 : vector<8x1xf32> to vector<8x8xf32>
    %32 = arith.subf %22, %31 : vector<8x8xf32>
    %cst_18 = arith.constant 0.000000e+00 : f32
    %33 = vector.broadcast %cst_18 : f32 to vector<8x8xf32>
    %34 = arith.minimumf %32, %33 : vector<8x8xf32>
    %35 = math.exp %34 : vector<8x8xf32>
    %cst_19 = arith.constant 0.000000e+00 : f32
    %36 = vector.broadcast %cst_19 : f32 to vector<8x8xf32>
    %37 = arith.select %3, %35, %36 : vector<8x8xi1>, vector<8x8xf32>
    %cst_20 = arith.constant dense<0.000000e+00> : vector<8xf32>
    %38 = vector.multi_reduction <add>, %37, %cst_20 [1] : vector<8x8xf32> to vector<8xf32>
    %39 = vector.shape_cast %38 : vector<8xf32> to vector<8x1xf32>
    %40 = arith.truncf %37 : vector<8x8xf32> to vector<8x8xbf16>
    %41 = arith.truncf %12 : vector<8x32xf32> to vector<8x32xbf16>
    %cst_21 = arith.constant dense<0.000000e+00> : vector<8x32xf32>
    %42 = tpu.matmul %40, %41, %cst_21 {dimension_numbers = #tpu.dot_dimension_numbers<[1], [0], [0], [1], [0, 0, 1, 1], [], []>} : vector<8x8xbf16>, vector<8x32xbf16>, vector<8x32xf32> -> vector<8x32xf32>
    %cst_22 = arith.constant 0.000000e+00 : f32
    %43 = vector.broadcast %cst_22 : f32 to vector<8x1xf32>
    %44 = arith.cmpf oeq, %39, %43 : vector<8x1xf32>
    %cst_23 = arith.constant 1.000000e+00 : f32
    %45 = vector.broadcast %cst_23 : f32 to vector<8x1xf32>
    %46 = arith.select %44, %45, %39 : vector<8x1xi1>, vector<8x1xf32>
    %47 = tpu.reciprocal %46 {approx = true} : vector<8x1xf32> -> vector<8x1xf32>
    %cst_24 = arith.constant 5.000000e-01 : f32
    %48 = vector.broadcast %cst_24 : f32 to vector<8x1xf32>
    %49 = arith.mulf %47, %48 : vector<8x1xf32>
    %50 = vector.broadcast %49 : vector<8x1xf32> to vector<8x32xf32>
    %51 = arith.mulf %42, %50 : vector<8x32xf32>
    %52 = arith.addf %11, %51 : vector<8x32xf32>
    %53 = vector.extract_strided_slice %9 {offsets = [0, 32], sizes = [8, 32], strides = [1, 1]} : vector<8x66xf32> to vector<8x32xf32>
    %54 = vector.extract_strided_slice %9 {offsets = [0, 65], sizes = [8, 1], strides = [1, 1]} : vector<8x66xf32> to vector<8x1xf32>
    %55 = vector.extract_strided_slice %10 {offsets = [1, 0], sizes = [1, 8], strides = [1, 1]} : vector<2x8xf32> to vector<1x8xf32>
    %56 = vector.broadcast %54 : vector<8x1xf32> to vector<8x8xf32>
    %57 = vector.broadcast %55 : vector<1x8xf32> to vector<8x8xf32>
    %58 = arith.addf %56, %57 : vector<8x8xf32>
    %cst_25 = arith.constant 0.000000e+00 : f32
    %59 = vector.broadcast %cst_25 : f32 to vector<8x8xf32>
    %60 = arith.cmpf ogt, %58, %59 : vector<8x8xf32>
    %cst_26 = arith.constant 2.000000e-01 : f32
    %61 = vector.broadcast %cst_26 : f32 to vector<8x8xf32>
    %62 = arith.mulf %61, %58 : vector<8x8xf32>
    %63 = arith.select %60, %58, %62 : vector<8x8xi1>, vector<8x8xf32>
    %cst_27 = arith.constant -1.000000e+30 : f32
    %64 = vector.broadcast %cst_27 : f32 to vector<8x8xf32>
    %65 = arith.select %3, %63, %64 : vector<8x8xi1>, vector<8x8xf32>
    %cst_28 = arith.constant dense<0xFF800000> : vector<8xf32>
    %66 = vector.multi_reduction <maximumf>, %65, %cst_28 [1] : vector<8x8xf32> to vector<8xf32>
    %67 = vector.shape_cast %66 : vector<8xf32> to vector<8x1xf32>
    %cst_29 = arith.constant -1.000000e+30 : f32
    %68 = vector.broadcast %cst_29 : f32 to vector<8x1xf32>
    %69 = arith.cmpf ole, %67, %68 : vector<8x1xf32>
    %cst_30 = arith.constant 0.000000e+00 : f32
    %70 = vector.broadcast %cst_30 : f32 to vector<8x1xf32>
    %71 = arith.select %69, %70, %67 : vector<8x1xi1>, vector<8x1xf32>
    %72 = vector.broadcast %71 : vector<8x1xf32> to vector<8x8xf32>
    %73 = arith.subf %63, %72 : vector<8x8xf32>
    %cst_31 = arith.constant 0.000000e+00 : f32
    %74 = vector.broadcast %cst_31 : f32 to vector<8x8xf32>
    %75 = arith.minimumf %73, %74 : vector<8x8xf32>
    %76 = math.exp %75 : vector<8x8xf32>
    %cst_32 = arith.constant 0.000000e+00 : f32
    %77 = vector.broadcast %cst_32 : f32 to vector<8x8xf32>
    %78 = arith.select %3, %76, %77 : vector<8x8xi1>, vector<8x8xf32>
    %cst_33 = arith.constant dense<0.000000e+00> : vector<8xf32>
    %79 = vector.multi_reduction <add>, %78, %cst_33 [1] : vector<8x8xf32> to vector<8xf32>
    %80 = vector.shape_cast %79 : vector<8xf32> to vector<8x1xf32>
    %81 = arith.truncf %78 : vector<8x8xf32> to vector<8x8xbf16>
    %82 = arith.truncf %53 : vector<8x32xf32> to vector<8x32xbf16>
    %cst_34 = arith.constant dense<0.000000e+00> : vector<8x32xf32>
    %83 = tpu.matmul %81, %82, %cst_34 {dimension_numbers = #tpu.dot_dimension_numbers<[1], [0], [0], [1], [0, 0, 1, 1], [], []>} : vector<8x8xbf16>, vector<8x32xbf16>, vector<8x32xf32> -> vector<8x32xf32>
    %cst_35 = arith.constant 0.000000e+00 : f32
    %84 = vector.broadcast %cst_35 : f32 to vector<8x1xf32>
    %85 = arith.cmpf oeq, %80, %84 : vector<8x1xf32>
    %cst_36 = arith.constant 1.000000e+00 : f32
    %86 = vector.broadcast %cst_36 : f32 to vector<8x1xf32>
    %87 = arith.select %85, %86, %80 : vector<8x1xi1>, vector<8x1xf32>
    %88 = tpu.reciprocal %87 {approx = true} : vector<8x1xf32> -> vector<8x1xf32>
    %cst_37 = arith.constant 5.000000e-01 : f32
    %89 = vector.broadcast %cst_37 : f32 to vector<8x1xf32>
    %90 = arith.mulf %88, %89 : vector<8x1xf32>
    %91 = vector.broadcast %90 : vector<8x1xf32> to vector<8x32xf32>
    %92 = arith.mulf %83, %91 : vector<8x32xf32>
    %93 = arith.addf %52, %92 : vector<8x32xf32>
    %94 = vector.broadcast %7 : vector<1x32xf32> to vector<8x32xf32>
    %95 = arith.addf %93, %94 : vector<8x32xf32>
    %cst_38 = arith.constant 0.000000e+00 : f32
    %96 = vector.broadcast %cst_38 : f32 to vector<8x32xf32>
    %97 = arith.cmpf ogt, %95, %96 : vector<8x32xf32>
    %cst_39 = arith.constant 0.000000e+00 : f32
    %98 = vector.broadcast %cst_39 : f32 to vector<8x32xf32>
    %99 = arith.minimumf %95, %98 : vector<8x32xf32>
    %100 = math.exp %99 : vector<8x32xf32>
    %cst_40 = arith.constant 1.000000e+00 : f32
    %101 = vector.broadcast %cst_40 : f32 to vector<8x32xf32>
    %102 = arith.subf %100, %101 : vector<8x32xf32>
    %103 = arith.select %97, %95, %102 : vector<8x32xi1>, vector<8x32xf32>
    %c0_41 = arith.constant 0 : index
    %c0_42 = arith.constant 0 : index
    %104 = vector.load %arg5[%c0_41, %c0_42] : memref<32x66xbf16, #tpu.memory_space<vmem>>, vector<32x66xbf16>
    %c0_43 = arith.constant 0 : index
    %c0_44 = arith.constant 0 : index
    %105 = vector.load %arg6[%c0_43, %c0_44] : memref<2x32xbf16, #tpu.memory_space<vmem>>, vector<2x32xbf16>
    %c0_45 = arith.constant 0 : index
    %c0_46 = arith.constant 0 : index
    %106 = vector.load %arg7[%c0_45, %c0_46] : memref<1x32xf32, #tpu.memory_space<vmem>>, vector<1x32xf32>
    %107 = arith.truncf %103 : vector<8x32xf32> to vector<8x32xbf16>
    %cst_47 = arith.constant dense<0.000000e+00> : vector<8x66xf32>
    %108 = tpu.matmul %107, %104, %cst_47 {dimension_numbers = #tpu.dot_dimension_numbers<[1], [0], [0], [1], [0, 0, 1, 1], [], []>} : vector<8x32xbf16>, vector<32x66xbf16>, vector<8x66xf32> -> vector<8x66xf32>
    %cst_48 = arith.constant dense<0.000000e+00> : vector<2x8xf32>
    %109 = tpu.matmul %105, %107, %cst_48 {dimension_numbers = #tpu.dot_dimension_numbers<[1], [1], [0], [0], [0, 0, 1, 0], [], []>} : vector<2x32xbf16>, vector<8x32xbf16>, vector<2x8xf32> -> vector<2x8xf32>
    %cst_49 = arith.constant 0.000000e+00 : f32
    %110 = vector.broadcast %cst_49 : f32 to vector<8x32xf32>
    %111 = vector.extract_strided_slice %108 {offsets = [0, 0], sizes = [8, 32], strides = [1, 1]} : vector<8x66xf32> to vector<8x32xf32>
    %112 = vector.extract_strided_slice %108 {offsets = [0, 64], sizes = [8, 1], strides = [1, 1]} : vector<8x66xf32> to vector<8x1xf32>
    %113 = vector.extract_strided_slice %109 {offsets = [0, 0], sizes = [1, 8], strides = [1, 1]} : vector<2x8xf32> to vector<1x8xf32>
    %114 = vector.broadcast %112 : vector<8x1xf32> to vector<8x8xf32>
    %115 = vector.broadcast %113 : vector<1x8xf32> to vector<8x8xf32>
    %116 = arith.addf %114, %115 : vector<8x8xf32>
    %cst_50 = arith.constant 0.000000e+00 : f32
    %117 = vector.broadcast %cst_50 : f32 to vector<8x8xf32>
    %118 = arith.cmpf ogt, %116, %117 : vector<8x8xf32>
    %cst_51 = arith.constant 2.000000e-01 : f32
    %119 = vector.broadcast %cst_51 : f32 to vector<8x8xf32>
    %120 = arith.mulf %119, %116 : vector<8x8xf32>
    %121 = arith.select %118, %116, %120 : vector<8x8xi1>, vector<8x8xf32>
    %cst_52 = arith.constant -1.000000e+30 : f32
    %122 = vector.broadcast %cst_52 : f32 to vector<8x8xf32>
    %123 = arith.select %3, %121, %122 : vector<8x8xi1>, vector<8x8xf32>
    %cst_53 = arith.constant dense<0xFF800000> : vector<8xf32>
    %124 = vector.multi_reduction <maximumf>, %123, %cst_53 [1] : vector<8x8xf32> to vector<8xf32>
    %125 = vector.shape_cast %124 : vector<8xf32> to vector<8x1xf32>
    %cst_54 = arith.constant -1.000000e+30 : f32
    %126 = vector.broadcast %cst_54 : f32 to vector<8x1xf32>
    %127 = arith.cmpf ole, %125, %126 : vector<8x1xf32>
    %cst_55 = arith.constant 0.000000e+00 : f32
    %128 = vector.broadcast %cst_55 : f32 to vector<8x1xf32>
    %129 = arith.select %127, %128, %125 : vector<8x1xi1>, vector<8x1xf32>
    %130 = vector.broadcast %129 : vector<8x1xf32> to vector<8x8xf32>
    %131 = arith.subf %121, %130 : vector<8x8xf32>
    %cst_56 = arith.constant 0.000000e+00 : f32
    %132 = vector.broadcast %cst_56 : f32 to vector<8x8xf32>
    %133 = arith.minimumf %131, %132 : vector<8x8xf32>
    %134 = math.exp %133 : vector<8x8xf32>
    %cst_57 = arith.constant 0.000000e+00 : f32
    %135 = vector.broadcast %cst_57 : f32 to vector<8x8xf32>
    %136 = arith.select %3, %134, %135 : vector<8x8xi1>, vector<8x8xf32>
    %cst_58 = arith.constant dense<0.000000e+00> : vector<8xf32>
    %137 = vector.multi_reduction <add>, %136, %cst_58 [1] : vector<8x8xf32> to vector<8xf32>
    %138 = vector.shape_cast %137 : vector<8xf32> to vector<8x1xf32>
    %139 = arith.truncf %136 : vector<8x8xf32> to vector<8x8xbf16>
    %140 = arith.truncf %111 : vector<8x32xf32> to vector<8x32xbf16>
    %cst_59 = arith.constant dense<0.000000e+00> : vector<8x32xf32>
    %141 = tpu.matmul %139, %140, %cst_59 {dimension_numbers = #tpu.dot_dimension_numbers<[1], [0], [0], [1], [0, 0, 1, 1], [], []>} : vector<8x8xbf16>, vector<8x32xbf16>, vector<8x32xf32> -> vector<8x32xf32>
    %cst_60 = arith.constant 0.000000e+00 : f32
    %142 = vector.broadcast %cst_60 : f32 to vector<8x1xf32>
    %143 = arith.cmpf oeq, %138, %142 : vector<8x1xf32>
    %cst_61 = arith.constant 1.000000e+00 : f32
    %144 = vector.broadcast %cst_61 : f32 to vector<8x1xf32>
    %145 = arith.select %143, %144, %138 : vector<8x1xi1>, vector<8x1xf32>
    %146 = tpu.reciprocal %145 {approx = true} : vector<8x1xf32> -> vector<8x1xf32>
    %cst_62 = arith.constant 5.000000e-01 : f32
    %147 = vector.broadcast %cst_62 : f32 to vector<8x1xf32>
    %148 = arith.mulf %146, %147 : vector<8x1xf32>
    %149 = vector.broadcast %148 : vector<8x1xf32> to vector<8x32xf32>
    %150 = arith.mulf %141, %149 : vector<8x32xf32>
    %151 = arith.addf %110, %150 : vector<8x32xf32>
    %152 = vector.extract_strided_slice %108 {offsets = [0, 32], sizes = [8, 32], strides = [1, 1]} : vector<8x66xf32> to vector<8x32xf32>
    %153 = vector.extract_strided_slice %108 {offsets = [0, 65], sizes = [8, 1], strides = [1, 1]} : vector<8x66xf32> to vector<8x1xf32>
    %154 = vector.extract_strided_slice %109 {offsets = [1, 0], sizes = [1, 8], strides = [1, 1]} : vector<2x8xf32> to vector<1x8xf32>
    %155 = vector.broadcast %153 : vector<8x1xf32> to vector<8x8xf32>
    %156 = vector.broadcast %154 : vector<1x8xf32> to vector<8x8xf32>
    %157 = arith.addf %155, %156 : vector<8x8xf32>
    %cst_63 = arith.constant 0.000000e+00 : f32
    %158 = vector.broadcast %cst_63 : f32 to vector<8x8xf32>
    %159 = arith.cmpf ogt, %157, %158 : vector<8x8xf32>
    %cst_64 = arith.constant 2.000000e-01 : f32
    %160 = vector.broadcast %cst_64 : f32 to vector<8x8xf32>
    %161 = arith.mulf %160, %157 : vector<8x8xf32>
    %162 = arith.select %159, %157, %161 : vector<8x8xi1>, vector<8x8xf32>
    %cst_65 = arith.constant -1.000000e+30 : f32
    %163 = vector.broadcast %cst_65 : f32 to vector<8x8xf32>
    %164 = arith.select %3, %162, %163 : vector<8x8xi1>, vector<8x8xf32>
    %cst_66 = arith.constant dense<0xFF800000> : vector<8xf32>
    %165 = vector.multi_reduction <maximumf>, %164, %cst_66 [1] : vector<8x8xf32> to vector<8xf32>
    %166 = vector.shape_cast %165 : vector<8xf32> to vector<8x1xf32>
    %cst_67 = arith.constant -1.000000e+30 : f32
    %167 = vector.broadcast %cst_67 : f32 to vector<8x1xf32>
    %168 = arith.cmpf ole, %166, %167 : vector<8x1xf32>
    %cst_68 = arith.constant 0.000000e+00 : f32
    %169 = vector.broadcast %cst_68 : f32 to vector<8x1xf32>
    %170 = arith.select %168, %169, %166 : vector<8x1xi1>, vector<8x1xf32>
    %171 = vector.broadcast %170 : vector<8x1xf32> to vector<8x8xf32>
    %172 = arith.subf %162, %171 : vector<8x8xf32>
    %cst_69 = arith.constant 0.000000e+00 : f32
    %173 = vector.broadcast %cst_69 : f32 to vector<8x8xf32>
    %174 = arith.minimumf %172, %173 : vector<8x8xf32>
    %175 = math.exp %174 : vector<8x8xf32>
    %cst_70 = arith.constant 0.000000e+00 : f32
    %176 = vector.broadcast %cst_70 : f32 to vector<8x8xf32>
    %177 = arith.select %3, %175, %176 : vector<8x8xi1>, vector<8x8xf32>
    %cst_71 = arith.constant dense<0.000000e+00> : vector<8xf32>
    %178 = vector.multi_reduction <add>, %177, %cst_71 [1] : vector<8x8xf32> to vector<8xf32>
    %179 = vector.shape_cast %178 : vector<8xf32> to vector<8x1xf32>
    %180 = arith.truncf %177 : vector<8x8xf32> to vector<8x8xbf16>
    %181 = arith.truncf %152 : vector<8x32xf32> to vector<8x32xbf16>
    %cst_72 = arith.constant dense<0.000000e+00> : vector<8x32xf32>
    %182 = tpu.matmul %180, %181, %cst_72 {dimension_numbers = #tpu.dot_dimension_numbers<[1], [0], [0], [1], [0, 0, 1, 1], [], []>} : vector<8x8xbf16>, vector<8x32xbf16>, vector<8x32xf32> -> vector<8x32xf32>
    %cst_73 = arith.constant 0.000000e+00 : f32
    %183 = vector.broadcast %cst_73 : f32 to vector<8x1xf32>
    %184 = arith.cmpf oeq, %179, %183 : vector<8x1xf32>
    %cst_74 = arith.constant 1.000000e+00 : f32
    %185 = vector.broadcast %cst_74 : f32 to vector<8x1xf32>
    %186 = arith.select %184, %185, %179 : vector<8x1xi1>, vector<8x1xf32>
    %187 = tpu.reciprocal %186 {approx = true} : vector<8x1xf32> -> vector<8x1xf32>
    %cst_75 = arith.constant 5.000000e-01 : f32
    %188 = vector.broadcast %cst_75 : f32 to vector<8x1xf32>
    %189 = arith.mulf %187, %188 : vector<8x1xf32>
    %190 = vector.broadcast %189 : vector<8x1xf32> to vector<8x32xf32>
    %191 = arith.mulf %182, %190 : vector<8x32xf32>
    %192 = arith.addf %151, %191 : vector<8x32xf32>
    %193 = vector.broadcast %106 : vector<1x32xf32> to vector<8x32xf32>
    %194 = arith.addf %192, %193 : vector<8x32xf32>
    %cst_76 = arith.constant 0.000000e+00 : f32
    %195 = vector.broadcast %cst_76 : f32 to vector<8x32xf32>
    %196 = arith.cmpf ogt, %194, %195 : vector<8x32xf32>
    %cst_77 = arith.constant 0.000000e+00 : f32
    %197 = vector.broadcast %cst_77 : f32 to vector<8x32xf32>
    %198 = arith.minimumf %194, %197 : vector<8x32xf32>
    %199 = math.exp %198 : vector<8x32xf32>
    %cst_78 = arith.constant 1.000000e+00 : f32
    %200 = vector.broadcast %cst_78 : f32 to vector<8x32xf32>
    %201 = arith.subf %199, %200 : vector<8x32xf32>
    %202 = arith.select %196, %194, %201 : vector<8x32xi1>, vector<8x32xf32>
    %c0_79 = arith.constant 0 : index
    %c0_80 = arith.constant 0 : index
    %203 = vector.load %arg8[%c0_79, %c0_80] : memref<8x32xf32, #tpu.memory_space<vmem>>, vector<8x32xf32>
    tpu.vector_store %arg8[%c0_79, %c0_80], %202 {strides = array<i32>} : memref<8x32xf32, #tpu.memory_space<vmem>>, vector<8x32xf32>,
    return
  }
}

</mosaic_0001>

<bundles_post_ra>
// kernel: tpu_custom_call.1
= control target key start
LH: loop header
LB: loop body
LE: loop exit
PB: predicated region body
PF: predicated region fallthrough
CT: control target
= control target key end

     0   :  { %13 = vsyncpa [#allocation3], 0  ;;  %s1114_s0 = inlined_call_operand.hbm [shape: f32[8,16], index: 0, kind: input, shape index: {}]   ;;  %s1115_s1 = inlined_call_operand.vmem [shape: s8[8,8], index: 1, kind: input, shape index: {}]   ;;  %s1116_s2 = inlined_call_operand.hbm [shape: bf16[16,66], index: 2, kind: input, shape index: {}]   ;;  %s1117_s3 = inlined_call_operand.hbm [shape: bf16[2,16], index: 3, kind: input, shape index: {}]   ;;  %s1118_s4 = inlined_call_operand.hbm [shape: f32[1,32], index: 4, kind: input, shape index: {}]   ;;  %s1119_s5 = inlined_call_operand.vmem [shape: bf16[32,66], index: 5, kind: input, shape index: {}]   ;;  %s1120_s6 = inlined_call_operand.vmem [shape: bf16[2,32], index: 6, kind: input, shape index: {}]   ;;  %s1121_s7 = inlined_call_operand.vmem [shape: f32[1,32], index: 7, kind: input, shape index: {}]   ;;  %s1122_s8 = inlined_call_operand.hbm [shape: f32[8,32], index: 8, kind: output, shape index: {}]  }
   0x1   :  { %14 = vsyncpa [#allocation6], 0 }
   0x2   :  { %15 = vsyncpa [#allocation9], 0 }
   0x3   :  { %16 = vsyncpa [#allocation4], 0  ;;  %s901_s27 = smov [#allocation5]   ;;  %s783_s9 = scalar_lea.hbm %s1116_s2, 128 }
   0x4   :  { %s34_s28 = sshll.u32 %s901_s27, 4  ;;  %p784_p0 = scmp.ne.s32.totalorder %s1116_s2, %s783_s9  ;;  %s35_s28 = int_to_ptr.vmem [resolvable:$true] %s34_s28 }
   0x5   :  { %p787_p1 = scmp.lt.u32.totalorder %s783_s9, %s1116_s2 }
   0x7   :  { %p789_p2 = pnand %p787_p1, %p784_p0 }
   0x9   :  { %792 = shalt.err (!%p789_p2)
}
   0xa   :  { %s793_s14 = scalar_lea.vmem %s35_s28, 128  ;;  %p798_p4 = scmp.lt.s32.totalorder %s35_s28, %s35_s28 }
   0xb   :  { %p794_p3 = scmp.ne.s32.totalorder %s35_s28, %s793_s14  ;;  %p799_p5 = scmp.lt.s32.totalorder %s793_s14, %s793_s14 }
   0xd   :  { %p800_p6 = por %p799_p5, %p798_p4 }
   0xf   :  { %p801_p7 = pnand %p800_p6, %p794_p3 }
  0x11   :  { %804 = shalt.err (!%p801_p7)
}
  0x12   :  { %s902_s15 = smov 64   ;;  %s903_s16 = smov 4  }
  0x13   :  { %40 = dma.hbm_to_vmem [thread:$0]  %s1116_s2, 128, %s35_s28, [#allocation6], %s902_s15, %s902_s15, %s903_s16  }
  0x14   :  { %s904_s19 = smov [#allocation2]   ;;  %s905_s21 = smov [#allocation7]  }
  0x15   :  { %s23_s20 = sshll.u32 %s904_s19, 4  ;;  %s47_s22 = sshll.u32 %s905_s21, 4  ;;  %s24_s20 = int_to_ptr.vmem [resolvable:$true] %s23_s20  ;;  %s48_s22 = int_to_ptr.vmem [resolvable:$true] %s47_s22 }
  0x16   :  { %s805_s25 = scalar_lea.hbm %s1114_s0, 128 }
  0x17   :  { %p806_p8 = scmp.ne.s32.totalorder %s1114_s0, %s805_s25  ;;  %p809_p9 = scmp.lt.u32.totalorder %s805_s25, %s1114_s0 }
  0x19   :  { %p811_p10 = pnand %p809_p9, %p806_p8 }
  0x1b   :  { %814 = shalt.err (!%p811_p10)
}
  0x1c   :  { %s815_s2 = scalar_lea.vmem %s24_s20, 128  ;;  %p820_p12 = scmp.lt.s32.totalorder %s24_s20, %s24_s20 }
  0x1d   :  { %p816_p11 = scmp.ne.s32.totalorder %s24_s20, %s815_s2  ;;  %p821_p13 = scmp.lt.s32.totalorder %s815_s2, %s815_s2 }
  0x1f   :  { %p822_p0 = por %p821_p13, %p820_p12 }
  0x21   :  { %p823_p1 = pnand %p822_p0, %p816_p11 }
  0x23   :  { %826 = shalt.err (!%p823_p1)
}
  0x24   :  { %26 = dma.hbm_to_vmem [thread:$0]  %s1114_s0, 128, %s24_s20, [#allocation3]  }
  0x25   :  { %s827_s12 = scalar_lea.hbm %s1117_s3, 16 }
  0x26   :  { %p828_p2 = scmp.ne.s32.totalorder %s1117_s3, %s827_s12  ;;  %p831_p3 = scmp.lt.u32.totalorder %s827_s12, %s1117_s3 }
  0x28   :  { %p833_p4 = pnand %p831_p3, %p828_p2 }
  0x2a   :  { %836 = shalt.err (!%p833_p4)
}
  0x2b   :  { %s837_s17 = scalar_lea.vmem %s48_s22, 16  ;;  %s841_s18 = scalar_lea.vmem %s48_s22, 32 }
  0x2c   :  { %p838_p5 = scmp.ne.s32.totalorder %s48_s22, %s837_s17  ;;  %p842_p6 = scmp.lt.s32.totalorder %s48_s22, %s48_s22 }
  0x2d   :  { %p843_p7 = scmp.lt.s32.totalorder %s841_s18, %s837_s17 }
  0x2f   :  { %p844_p8 = por %p843_p7, %p842_p6 }
  0x31   :  { %p845_p9 = pnand %p844_p8, %p838_p5 }
  0x33   :  { %848 = shalt.err (!%p845_p9)
}
  0x34   :  { %50 = dma.hbm_to_vmem [thread:$0]  %s1117_s3, 16, %s48_s22, [#allocation6]  }
  0x35   :  { %s906_s20 = smov [#allocation8]   ;;  %s849_s25 = scalar_lea.hbm %s1118_s4, 16 }
  0x36   :  { %s57_s21 = sshll.u32 %s906_s20, 4  ;;  %p850_p10 = scmp.ne.s32.totalorder %s1118_s4, %s849_s25  ;;  %s58_s21 = int_to_ptr.vmem [resolvable:$true] %s57_s21 }
  0x37   :  { %p853_p11 = scmp.lt.u32.totalorder %s849_s25, %s1118_s4 }
  0x39   :  { %p855_p12 = pnand %p853_p11, %p850_p10 }
  0x3b   :  { %858 = shalt.err (!%p855_p12)
}
  0x3c   :  { %s859_s2 = scalar_lea.vmem %s58_s21, 16  ;;  %s863_s3 = scalar_lea.vmem %s58_s21, 32 }
  0x3d   :  { %p860_p13 = scmp.ne.s32.totalorder %s58_s21, %s859_s2  ;;  %p864_p0 = scmp.lt.s32.totalorder %s58_s21, %s58_s21 }
  0x3e   :  { %p865_p1 = scmp.lt.s32.totalorder %s863_s3, %s859_s2 }
  0x40   :  { %p866_p2 = por %p865_p1, %p864_p0 }
  0x42   :  { %p867_p3 = pnand %p866_p2, %p860_p13 }
  0x44   :  { %870 = shalt.err (!%p867_p3)
}
  0x45   :  { %60 = dma.hbm_to_vmem [thread:$0]  %s1118_s4, 16, %s58_s21, [#allocation9]  }
  0x46   :  { %893 = dma.done.wait [#allocation3], 128  }
  0x47   :  { %894 = vsyncadd [#allocation3], 4294967168 }
  0x48   :  { %895 = dma.done.wait [#allocation6], 144  }
  0x49   :  { %896 = vsyncadd [#allocation6], 4294967152 }
  0x4a   :  { %897 = dma.done.wait [#allocation9], 16  }
  0x4b   :  { %898 = vsyncadd [#allocation9], 4294967280  ;;  %v907_v0 = vmov 0.0   ;;  %vm908_vm0 = vmmov 0   ;;  %v909_v1 = vmov 64   ;;  %v760_v2 = vld [vmem:[#allocation5] sm:$0xff]   ;;  %v188_v18 = vlaneseq }
  0x4c   :  { %693 = vmatprep.subr.bf16.mxu0 %v907_v0  ;;  %695 = vmatprep.mubr.msk.bf16.mxu0 %vm908_vm0, %v907_v0  ;;  %v84_v3 = vld [vmem:[#allocation2] sm:$0xff]  ;;  %vm96_vm1 = vcmask 130048   ;;  %v87_v6 = vld [vmem:[#allocation7] sm:$0x1]  ;;  %v910_v7 = vmov 65   ;;  %vm216_vm2 = vcmask 1043456  }
  0x4d   :  { %699 = vmatprep.subr.bf16.mxu1 %v907_v0  ;;  %701 = vmatprep.mubr.msk.bf16.mxu1 %vm908_vm0, %v907_v0  ;;  %v89_v4 = vpack.c.bf16 %v84_v3, %v84_v3  ;;  %v1022_v19 = vshrl.u32 %v188_v18, 7  ;;  %v80_v20 = vld [vmem:[%s1115_s1] sm:$0x3]  ;;  %vm197_vm5 = vcmask 64512   ;;  %s911_s1 = smov 96   ;;  %v762_v60 = vld [vmem:[%s1119_s5 + $0x8] sm:$0xff]  }
  0x4e   :  { %755 = vset.pattern.permute.xlu0 %v909_v1  ;;  %694 = vmatpush3.bf16.msra.mxu0 %v760_v2  ;;  %v81_v22 = vunpack.c.0.s8 %v80_v20  ;;  %v761_v59 = vld [vmem:[%s1119_s5] sm:$0xff]   ;;  %vm380_vm12 = vcmask 261120   ;;  %s912_s16 = smov [#allocation10]  }
  0x4f   :  { %705 = vmatprep.subr.bf16.mxu0 %v907_v0  ;;  %v98_v5 = vsel %vm96_vm1, %v89_v4, 0  ;;  %758 = vset.pattern.permute.xlu1 %v910_v7  ;;  %v190_v21 = vsub.s32 0, %v1022_v19  ;;  %v272_v25 = vsub.s32 1, %v1022_v19  ;;  %s650_s17 = sshll.u32 %s912_s16, 4  ;;  %s651_s17 = int_to_ptr.vmem [resolvable:$true] %s650_s17 }
  0x50   :  { %700 = vmatpush3.bf16.xpose.msra.mxu1 %v98_v5  ;;  %v1030_v24 = vcvt.s32.f32 %v81_v22  ;;  %s871_s18 = scalar_lea.vmem %s651_s17, 128  ;;  %p876_p5 = scmp.lt.s32.totalorder %s651_s17, %s651_s17 }
  0x51   :  { %696 = vmatmul.mubr.msk.bf16.vlgmr.msra.gmra.mrb[0].mxu0 %vm96_vm1, %v89_v4  ;;  %711 = vmatprep.subr.bf16.mxu1 %v907_v0  ;;  %p872_p4 = scmp.ne.s32.totalorder %s651_s17, %s871_s18  ;;  %p877_p6 = scmp.lt.s32.totalorder %s871_s18, %s871_s18 }
  0x52   :  { %707 = vmatprep.mubr.msk.bf16.mxu0 %vm908_vm0, %v907_v0  ;;  %vm83_vm3 = vcmp.gt.f32.partialorder %v1030_v24, 0.0 }
  0x53   :  { %p878_p7 = por %p877_p6, %p876_p5 }
  0x55   :  { %p879_p8 = pnand %p878_p7, %p872_p4 }
  0x57   :  { %702 = vmatmul.mubr.msk.bf16.vlgmr.msra.gmra.mrb[0].mxu1 %vm96_vm1, %v87_v6 }
  0x58   :  { %713 = vmatprep.mubr.msk.bf16.mxu1 %vm908_vm0, %v907_v0 }
 0x124   :  { %v134_v8 = vpop.f32.mrb[0].mxu0 }
 0x125   :  { %v212_v9 = vpack.c.bf16 %v134_v8, %v134_v8  ;;  %185 = vperm.xlu0 %755, %v134_v8   ;;  %v697_v10 = vpop.f32.mrb[1].mxu0 }
 0x126   :  { %v137_v11 = vpop.f32.mrb[2].mxu0 }
 0x127   :  { %v698_v12 = vpop.f32.mrb[3].mxu0  ;;  %v218_v13 = vsel %vm216_vm2, %v212_v9, 0 }
 0x128   :  { %706 = vmatpush3.bf16.msra.mxu0 %v218_v13 }
 0x129   :  { %756 = vset.pattern.permute.xlu0 %v910_v7  ;;  %717 = vmatprep.subr.bf16.mxu0 %v907_v0 }
 0x12a   :  { %267 = vperm.xlu0 %756, %v134_v8   ;;  %v177_v14 = vpop.f32.mrb[0].mxu1 }
 0x12b   :  { %v703_v15 = vpop.f32.mrb[1].mxu1  ;;  %v191_v23 = vrot.slane %v177_v14, %v190_v21  ;;  %v273_v29 = vrot.slane %v177_v14, %v272_v25 }
 0x12c   :  { %v180_v16 = vpop.f32.mrb[2].mxu1  ;;  %v666_v15 = vld [vmem:[#allocation8] ss:$0 sm:$0xff] }
 0x12d   :  { %v704_v17 = vpop.f32.mrb[3].mxu1 }
 0x12e   :  { %757 = vset.pattern.permute.xlu0 %v909_v1 }
 0x1a4   :  { %v186_v26 = vpop.permute.xlu0 %185 }
 0x1a5   :  { %v192_v27 = vadd.f32 %v191_v23, %v186_v26 }
 0x1a7   :  { %v194_v28 = vmul.f32 0.2, %v192_v27  ;;  %vm193_vm4 = vcmp.gt.f32.partialorder %v192_v27, 0.0 }
 0x1a9   :  { %v268_v30 = vpop.permute.xlu0 %267  ;;  %v195_v31 = vsel %vm193_vm4, %v192_v27, %v194_v28 }
 0x1aa   :  { %v274_v32 = vadd.f32 %v273_v29, %v268_v30  ;;  %v196_v33 = vsel %vm83_vm3, %v195_v31, -1e+30 }
 0x1ab   :  { %v198_v34 = vsel %vm197_vm5, %v196_v33, -inf }
 0x1ac   :  { %v276_v35 = vmul.f32 0.2, %v274_v32  ;;  %199 = vmax.xlane.f32.xlu1 %v198_v34  ;;  %vm275_vm6 = vcmp.gt.f32.partialorder %v274_v32, 0.0 }
 0x1ae   :  { %v277_v36 = vsel %vm275_vm6, %v274_v32, %v276_v35 }
 0x1af   :  { %v278_v37 = vsel %vm83_vm3, %v277_v36, -1e+30 }
 0x1b0   :  { %v279_v38 = vsel %vm197_vm5, %v278_v37, -inf }
 0x1b1   :  { %280 = vmax.xlane.f32.xlu1 %v279_v38 }
 0x1c2   :  { %294 = vrot.lane.b32.xlu1 %v212_v9, %s911_s1 }
 0x239   :  { %v200_v39 = vpop.xlane.xlu1 %199 }
 0x23a   :  { %vm201_vm7 = vcmp.le.f32.partialorder %v200_v39, -1e+30 }
 0x23b   :  { %v202_v40 = vsel %vm201_vm7, 0.0, %v200_v39 }
 0x23c   :  { %v203_v41 = vsub.f32 %v195_v31, %v202_v40  ;;  %v365_v31 = vld [vmem:[%s1120_s6] sm:$0x1] }
 0x23e   :  { %v204_v42 = vmin.f32 %v203_v41, 0.0  ;;  %v281_v43 = vpop.xlane.xlu1 %280 }
 0x23f   :  { %vm282_vm8 = vcmp.le.f32.partialorder %v281_v43, -1e+30 }
 0x240   :  { %v205_v44 = vmul.f32 1.442695, %v204_v42  ;;  %v283_v45 = vsel %vm282_vm8, 0.0, %v281_v43 }
 0x241   :  { %v284_v46 = vsub.f32 %v277_v36, %v283_v45 }
 0x242   :  { %763 = vpow2.f32 %v205_v44  ;;  %v295_v47 = vpop.permute.xlu1 %294 }
 0x243   :  { %v285_v48 = vmin.f32 %v284_v46, 0.0  ;;  %v300_v49 = vsel %vm216_vm2, %v295_v47, 0 }
 0x244   :  { %712 = vmatpush3.bf16.msra.mxu1 %v300_v49 }
 0x245   :  { %v286_v50 = vmul.f32 1.442695, %v285_v48  ;;  %725 = vmatprep.subr.bf16.mxu1 %v907_v0 }
 0x247   :  { %765 = vpow2.f32 %v286_v50 }
 0x24c   :  { %v764_v51 = vpop.eup %763 }
 0x24d   :  { %v207_v52 = vsel %vm83_vm3, %v764_v51, 0.0 }
 0x24e   :  { %v208_v53 = vsel %vm197_vm5, %v207_v52, 0.0  ;;  %v211_v54 = vpack.c.bf16 %v207_v52, %v207_v52 }
 0x24f   :  { %209 = vadd.xlane.f32.xlu0 %v208_v53 }
 0x250   :  { %708 = vmatmul.mubr.msk.bf16.vlgmr.msra.gmra.mrb[4].mxu0 %vm197_vm5, %v211_v54 }
 0x251   :  { %v766_v55 = vpop.eup %765  ;;  %721 = vmatprep.mubr.msk.bf16.mxu0 %vm908_vm0, %v907_v0  ;;  %718 = vmatpush3.bf16.msra.mxu0 %v761_v59 }
 0x252   :  { %v288_v56 = vsel %vm83_vm3, %v766_v55, 0.0  ;;  %719 = vmatprep.subr.bf16.mxu0 %v907_v0 }
 0x253   :  { %v289_v57 = vsel %vm197_vm5, %v288_v56, 0.0  ;;  %v292_v58 = vpack.c.bf16 %v288_v56, %v288_v56 }
 0x254   :  { %290 = vadd.xlane.f32.xlu1 %v289_v57 }
 0x255   :  { %714 = vmatmul.mubr.msk.bf16.vlgmr.msra.gmra.mrb[4].mxu1 %vm197_vm5, %v292_v58  ;;  %720 = vmatpush3.bf16.msra.mxu0 %v762_v60 }
 0x256   :  { %727 = vmatprep.mubr.msk.bf16.mxu1 %vm908_vm0, %v907_v0  ;;  %731 = vmatprep.subr.bf16.mxu0 %v907_v0 }
 0x2dc   :  { %v210_v61 = vpop.xlane.xlu0 %209 }
 0x2dd   :  { %vm260_vm9 = vcmp.eq.f32.partialorder %v210_v61, 0.0 }
 0x2de   :  { %v261_v63 = vsel %vm260_vm9, 1.0, %v210_v61 }
 0x2df   :  { %767 = vrcp.f32 %v261_v63 }
 0x2e1   :  { %v291_v62 = vpop.xlane.xlu1 %290 }
 0x2e2   :  { %vm342_vm10 = vcmp.eq.f32.partialorder %v291_v62, 0.0 }
 0x2e3   :  { %v343_v1 = vsel %vm342_vm10, 1.0, %v291_v62 }
 0x2e4   :  { %769 = vrcp.f32 %v343_v1 }
 0x2e9   :  { %v768_v2 = vpop.eup %767 }
 0x2ea   :  { %v263_v9 = vmul.f32 0.5, %v768_v2 }
 0x2ee   :  { %v770_v4 = vpop.eup %769 }
 0x2ef   :  { %v345_v10 = vmul.f32 0.5, %v770_v4 }
 0x323   :  { %v254_v3 = vpop.f32.mrb[4].mxu0 }
 0x324   :  { %v709_v5 = vpop.f32.mrb[5].mxu0  ;;  %v264_v12 = vmul.f32 %v263_v9, %v254_v3 }
 0x325   :  { %v257_v6 = vpop.f32.mrb[6].mxu0 }
 0x326   :  { %v710_v8 = vpop.f32.mrb[7].mxu0 }
 0x328   :  { %v336_v11 = vpop.f32.mrb[4].mxu1 }
 0x329   :  { %v346_v13 = vmul.f32 %v345_v10, %v336_v11  ;;  %v715_v14 = vpop.f32.mrb[5].mxu1 }
 0x32a   :  { %v339_v16 = vpop.f32.mrb[6].mxu1 }
 0x32b   :  { %v347_v17 = vadd.f32 %v346_v13, %v264_v12  ;;  %v716_v18 = vpop.f32.mrb[7].mxu1 }
 0x32d   :  { %v354_v20 = vadd.f32 %v666_v15, %v347_v17 }
 0x32f   :  { %v356_v22 = vmin.f32 %v354_v20, 0.0  ;;  %vm355_vm11 = vcmp.gt.f32.partialorder %v354_v20, 0.0 }
 0x331   :  { %v357_v23 = vmul.f32 1.442695, %v356_v22 }
 0x333   :  { %771 = vpow2.f32 %v357_v23 }
 0x33d   :  { %v772_v26 = vpop.eup %771 }
 0x33e   :  { %v667_v27 = vadd.f32 -1.0, %v772_v26 }
 0x340   :  { %v360_v28 = vsel %vm355_vm11, %v354_v20, %v667_v27  ;;  %v674_v27 = vld [vmem:[%s1121_s7] ss:$0 sm:$0xff] }
 0x341   :  { %v367_v29 = vpack.c.bf16 %v360_v28, %v360_v28 }
 0x343   :  { %722 = vmatmul.mubr.msk.bf16.vlgmr.msra.gmra.mrb[8].mxu0 %vm380_vm12, %v367_v29  ;;  %v382_v30 = vsel %vm380_vm12, %v367_v29, 0 }
 0x344   :  { %726 = vmatpush3.bf16.xpose.msra.mxu1 %v382_v30  ;;  %733 = vmatprep.mubr.msk.bf16.mxu0 %vm908_vm0, %v907_v0 }
 0x345   :  { %737 = vmatprep.subr.bf16.mxu1 %v907_v0 }
 0x34b   :  { %728 = vmatmul.mubr.msk.bf16.vlgmr.msra.gmra.mrb[8].mxu1 %vm380_vm12, %v365_v31 }
 0x34c   :  { %739 = vmatprep.mubr.msk.bf16.mxu1 %vm908_vm0, %v907_v0 }
 0x416   :  { %v418_v32 = vpop.f32.mrb[8].mxu0 }
 0x417   :  { %v495_v33 = vpack.c.bf16 %v418_v32, %v418_v32  ;;  %549 = vperm.xlu1 %758, %v418_v32   ;;  %469 = vperm.xlu0 %757, %v418_v32   ;;  %v723_v34 = vpop.f32.mrb[9].mxu0 }
 0x418   :  { %v421_v35 = vpop.f32.mrb[10].mxu0 }
 0x419   :  { %v724_v36 = vpop.f32.mrb[11].mxu0  ;;  %v500_v37 = vsel %vm216_vm2, %v495_v33, 0 }
 0x41a   :  { %732 = vmatpush3.bf16.msra.mxu0 %v500_v37 }
 0x41b   :  { %759 = vset.pattern.permute.xlu0 %v910_v7 }
 0x41e   :  { %v461_v38 = vpop.f32.mrb[8].mxu1 }
 0x41f   :  { %v729_v39 = vpop.f32.mrb[9].mxu1  ;;  %v475_v42 = vrot.slane %v461_v38, %v190_v21  ;;  %v555_v0 = vrot.slane %v461_v38, %v272_v25 }
 0x420   :  { %v464_v40 = vpop.f32.mrb[10].mxu1 }
 0x421   :  { %v730_v41 = vpop.f32.mrb[11].mxu1 }
 0x496   :  { %v550_v43 = vpop.permute.xlu1 %549  ;;  %v470_v44 = vpop.permute.xlu0 %469 }
 0x497   :  { %v556_v45 = vadd.f32 %v555_v0, %v550_v43  ;;  %v476_v46 = vadd.f32 %v475_v42, %v470_v44 }
 0x499   :  { %v558_v47 = vmul.f32 0.2, %v556_v45  ;;  %v478_v48 = vmul.f32 0.2, %v476_v46  ;;  %vm557_vm13 = vcmp.gt.f32.partialorder %v556_v45, 0.0  ;;  %vm477_vm14 = vcmp.gt.f32.partialorder %v476_v46, 0.0 }
 0x49b   :  { %v559_v49 = vsel %vm557_vm13, %v556_v45, %v558_v47  ;;  %v479_v7 = vsel %vm477_vm14, %v476_v46, %v478_v48 }
 0x49c   :  { %v560_v50 = vsel %vm83_vm3, %v559_v49, -1e+30  ;;  %v480_v51 = vsel %vm83_vm3, %v479_v7, -1e+30 }
 0x49d   :  { %v561_v21 = vsel %vm197_vm5, %v560_v50, -inf  ;;  %v481_v19 = vsel %vm197_vm5, %v480_v51, -inf }
 0x49e   :  { %562 = vmax.xlane.f32.xlu0 %v561_v21  ;;  %482 = vmax.xlane.f32.xlu1 %v481_v19 }
 0x4af   :  { %576 = vrot.lane.b32.xlu1 %v495_v33, %s911_s1 }
 0x52b   :  { %v563_v25 = vpop.xlane.xlu0 %562  ;;  %v483_v52 = vpop.xlane.xlu1 %482 }
 0x52c   :  { %vm564_vm15 = vcmp.le.f32.partialorder %v563_v25, -1e+30  ;;  %vm484_vm0 = vcmp.le.f32.partialorder %v483_v52, -1e+30 }
 0x52d   :  { %v565_v53 = vsel %vm564_vm15, 0.0, %v563_v25  ;;  %v485_v54 = vsel %vm484_vm0, 0.0, %v483_v52 }
 0x52e   :  { %v566_v55 = vsub.f32 %v559_v49, %v565_v53  ;;  %v486_v56 = vsub.f32 %v479_v7, %v485_v54 }
 0x52f   :  { %v577_v57 = vpop.permute.xlu1 %576 }
 0x530   :  { %v567_v58 = vmin.f32 %v566_v55, 0.0  ;;  %v487_v59 = vmin.f32 %v486_v56, 0.0  ;;  %v582_v60 = vsel %vm216_vm2, %v577_v57, 0 }
 0x531   :  { %738 = vmatpush3.bf16.msra.mxu1 %v582_v60 }
 0x532   :  { %v568_v61 = vmul.f32 1.442695, %v567_v58  ;;  %v488_v62 = vmul.f32 1.442695, %v487_v59 }
 0x534   :  { %773 = vpow2.f32 %v568_v61 }
 0x535   :  { %775 = vpow2.f32 %v488_v62 }
 0x53e   :  { %v774_v63 = vpop.eup %773 }
 0x53f   :  { %v776_v1 = vpop.eup %775  ;;  %v570_v2 = vsel %vm83_vm3, %v774_v63, 0.0 }
 0x540   :  { %v490_v3 = vsel %vm83_vm3, %v776_v1, 0.0  ;;  %v574_v4 = vpack.c.bf16 %v570_v2, %v570_v2  ;;  %v571_v8 = vsel %vm197_vm5, %v570_v2, 0.0 }
 0x541   :  { %v491_v5 = vsel %vm197_vm5, %v490_v3, 0.0  ;;  %v494_v6 = vpack.c.bf16 %v490_v3, %v490_v3 }
 0x542   :  { %492 = vadd.xlane.f32.xlu0 %v491_v5  ;;  %740 = vmatmul.mubr.msk.bf16.vlgmr.msra.gmra.mrb[12].mxu1 %vm197_vm5, %v574_v4 }
 0x543   :  { %734 = vmatmul.mubr.msk.bf16.vlgmr.msra.gmra.mrb[12].mxu0 %vm197_vm5, %v494_v6 }
 0x546   :  { %572 = vadd.xlane.f32.xlu0 %v571_v8 }
 0x5cf   :  { %v493_v9 = vpop.xlane.xlu0 %492 }
 0x5d0   :  { %vm542_vm2 = vcmp.eq.f32.partialorder %v493_v9, 0.0 }
 0x5d1   :  { %v543_v12 = vsel %vm542_vm2, 1.0, %v493_v9 }
 0x5d3   :  { %v573_v10 = vpop.xlane.xlu0 %572 }
 0x5d4   :  { %vm624_vm1 = vcmp.eq.f32.partialorder %v573_v10, 0.0 }
 0x5d5   :  { %v625_v11 = vsel %vm624_vm1, 1.0, %v573_v10 }
 0x5d6   :  { %777 = vrcp.f32 %v625_v11 }
 0x5d7   :  { %779 = vrcp.f32 %v543_v12 }
 0x5e0   :  { %v778_v24 = vpop.eup %777 }
 0x5e1   :  { %v780_v13 = vpop.eup %779  ;;  %v627_v14 = vmul.f32 0.5, %v778_v24 }
 0x5e2   :  { %v545_v15 = vmul.f32 0.5, %v780_v13 }
 0x615   :  { %v618_v16 = vpop.f32.mrb[12].mxu1 }
 0x616   :  { %v536_v17 = vpop.f32.mrb[12].mxu0  ;;  %v628_v18 = vmul.f32 %v627_v14, %v618_v16  ;;  %v741_v20 = vpop.f32.mrb[13].mxu1 }
 0x617   :  { %v546_v22 = vmul.f32 %v545_v15, %v536_v17  ;;  %v735_v23 = vpop.f32.mrb[13].mxu0  ;;  %v621_v26 = vpop.f32.mrb[14].mxu1 }
 0x618   :  { %v539_v28 = vpop.f32.mrb[14].mxu0  ;;  %v742_v29 = vpop.f32.mrb[15].mxu1 }
 0x619   :  { %v629_v30 = vadd.f32 %v628_v18, %v546_v22  ;;  %v736_v31 = vpop.f32.mrb[15].mxu0 }
 0x61b   :  { %v636_v32 = vadd.f32 %v674_v27, %v629_v30 }
 0x61d   :  { %v638_v33 = vmin.f32 %v636_v32, 0.0  ;;  %vm637_vm3 = vcmp.gt.f32.partialorder %v636_v32, 0.0 }
 0x61f   :  { %v639_v34 = vmul.f32 1.442695, %v638_v33 }
 0x621   :  { %781 = vpow2.f32 %v639_v34 }
 0x62b   :  { %v782_v35 = vpop.eup %781 }
 0x62c   :  { %v675_v36 = vadd.f32 -1.0, %v782_v35 }
 0x62e   :  { %v642_v37 = vsel %vm637_vm3, %v636_v32, %v675_v36 }
 0x62f   :  { %643 = vst.msk [vmem:[#allocation10] sm:$0xff] %vm380_vm12, %v642_v37 }
 0x630   :  { %882 = shalt.err (!%p879_p8)
}
 0x631   :  { %s883_s19 = scalar_lea.hbm %s1122_s8, 128 }
 0x632   :  { %p884_p9 = scmp.ne.s32.totalorder %s1122_s8, %s883_s19  ;;  %p887_p10 = scmp.lt.u32.totalorder %s883_s19, %s1122_s8 }
 0x634   :  { %p889_p11 = pnand %p887_p10, %p884_p9 }
 0x636   :  { %892 = shalt.err (!%p889_p11)
}
 0x637   :  { %653 = dma.vmem_to_hbm [thread:$0]  %s651_s17, 128, %s1122_s8, [#allocation4]  }
 0x638   :  { %899 = dma.done.wait [#allocation4], 128  }
 0x639   :  { %900 = vsyncadd [#allocation4], 4294967168 }
 0x63a   :  { %657 = vsyncpa [#allocation3], 1 }
 0x63b   :  { %658 = vsyncpa [#allocation6], 1 }
 0x63c   :  { %659 = vsyncpa [#allocation9], 1 }
 0x63d   :  { %660 = vsyncpa [#allocation4], 1 }

</bundles_post_ra>
